<compile_context>
chip_gen: v7x
topology: tpu7x:2x2x1
jax: 0.10.0
libtpu: 0.0.40
codegen_flags: <defaults>
</compile_context>

<pallas_src>
import jax
import jax.numpy as jnp
from jax.experimental import pallas as pl
from jax.experimental.pallas import tpu as pltpu

# ---- Logical sizes (from the PyTorch module) --------------------------------
VOCAB = 3            # Embedding(3, 3)
EMB_D = 3
N_TOK = 10           # 10 tokens * 3 dims = 30 = Linear(30, ...) fan-in
IN_F = N_TOK * EMB_D       # 30
HID_F = 300
OUT_F = 9

# ---- Padded (lane-dense) kernel sizes ----------------------------------------
TOK_PAD = 16         # 10 int32 token ids -> 16 lanes (full-dim last-axis block)
IN_PAD = 128         # 30  -> 128 one-hot lanes
HID_PAD = 384        # 300 -> 384 (multiple of 128; 2 MXU passes on v6e/v7x)
OUT_PAD = 128        # 9   -> 128 (unmasked, lane-dense output stores)

TILE_CAP = 1024      # max batch tile (multiple of 256)


def _round_up(x, m):
    return ((x + m - 1) // m) * m


def _pick_tiling(B):
    """Batch tile + padded batch.

    Small batches: one minimal >=8-row tile (no pointless grid steps).
    Large batches: 256-aligned tiles up to TILE_CAP with >=2 grid steps so the
    'parallel' axis can shard across both v7x TensorCores.
    """
    b8 = _round_up(max(B, 8), 8)
    if b8 <= 256:
        return b8, b8
    b256 = _round_up(B, 256)
    tile_b = min(TILE_CAP, _round_up(pl.cdiv(b256, 2), 256))
    return tile_b, _round_up(B, tile_b)


def qmodel_kernel(cls_ref, rep_ref, tok_ref, w1_ref, b1_ref, w2_ref, b2_ref,
                  w3_ref, b3_ref, out_ref):
    """One batch tile of the fused forward pass.

    cls_ref : (1, IN_PAD)        f32   lane pattern f % 3 (f < 30), -1 on pad
    rep_ref : (TOK_PAD, IN_PAD)  bf16  0/1 replication matrix (slot -> 3 lanes)
    tok_ref : (TILE_B, TOK_PAD)  int32 raw token ids, zero-padded
    w1_ref  : (IN_PAD, HID_PAD)  bf16  block_diag(relu(emb_table)) @ W1, padded
    """
    # Expand packed ids to per-lane token values: lane f (<30) gets
    # states[b, f // 3].  rep is 0/1 and ids are 0..2, so this is exact.
    tok_exp = jnp.dot(tok_ref[...].astype(jnp.bfloat16), rep_ref[...],
                      preferred_element_type=jnp.float32)         # (TILE_B, 128)

    # Fused embedding gather + first ReLU: one-hot(states) via a single VPU
    # compare; relu(embedding_table) is already folded into w1 host-side.
    onehot = (tok_exp == cls_ref[...]).astype(jnp.bfloat16)       # exact 0/1

    h1 = jnp.dot(onehot, w1_ref[...], preferred_element_type=jnp.float32)
    h1 = jnp.maximum(h1 + b1_ref[...], 0.0).astype(jnp.bfloat16)  # relu(layer1)

    h2 = jnp.dot(h1, w2_ref[...], preferred_element_type=jnp.float32)
    h2 = jnp.maximum(h2 + b2_ref[...], 0.0).astype(jnp.bfloat16)  # relu(layer2)

    h3 = jnp.dot(h2, w3_ref[...], preferred_element_type=jnp.float32)
    out_ref[...] = h3 + b3_ref[...]                # lane-dense (TILE_B, 128) f32


def prepare_kernel_params(params):
    """Fold relu(embedding) into layer1, cast weights to bf16, zero-pad lane-dense."""
    relu_emb = jnp.maximum(params["embedding"], 0.0)                # (3, 3)
    # Block-diagonal with 10 copies: maps flat one-hot (B,30) -> relu'd
    # embedded features (B,30); folded directly into W1.
    bd = jnp.kron(jnp.eye(N_TOK, dtype=jnp.float32), relu_emb)      # (30, 30)
    w1_fused = bd @ params["w1"]                                    # (30, 300)

    def pad2(x, rows, cols, dtype=jnp.float32):
        z = jnp.zeros((rows, cols), dtype)
        return z.at[: x.shape[0], : x.shape[1]].set(x.astype(dtype))

    lane = jnp.arange(IN_PAD, dtype=jnp.int32)
    # Class id per lane (f % 3) on real lanes, -1 on pad lanes so the in-kernel
    # compare against tok_exp (0 on pad lanes) is guaranteed 0 there.
    cls = jnp.where(lane < IN_F, (lane % EMB_D).astype(jnp.float32),
                    -1.0).reshape(1, IN_PAD)

    slot = jnp.arange(TOK_PAD, dtype=jnp.int32)
    rep = ((lane[None, :] // EMB_D) == slot[:, None]) & (lane[None, :] < IN_F)
    rep = rep.astype(jnp.bfloat16)                                  # (16, 128)

    return {
        "cls": cls,
        "rep": rep,
        "w1": pad2(w1_fused, IN_PAD, HID_PAD, jnp.bfloat16),
        "b1": pad2(params["b1"], 1, HID_PAD),
        "w2": pad2(params["w2"], HID_PAD, HID_PAD, jnp.bfloat16),
        "b2": pad2(params["b2"], 1, HID_PAD),
        "w3": pad2(params["w3"], HID_PAD, OUT_PAD, jnp.bfloat16),
        "b3": pad2(params["b3"], 1, OUT_PAD),
    }


def qmodel_forward(states, kparams):
    """states: int32 (B, 10) with values in [0, VOCAB). Returns (B, 9) f32."""
    B = states.shape[0]
    tile_b, b_pad = _pick_tiling(B)

    # Tiny int32 glue only: pad ids to (b_pad, 16); expansion happens on-chip.
    tok = jnp.pad(states.astype(jnp.int32),
                  ((0, b_pad - B), (0, TOK_PAD - N_TOK)))           # (b_pad, 16)

    grid = (b_pad // tile_b,)
    resident = lambda i: (0, 0)     # weights/biases: same block every grid step
    batch_tile = lambda i: (i, 0)   # activations stream over the batch axis

    # Advisory cost hint so XLA overlaps the surrounding pad/slice glue.
    flops = 2 * b_pad * (TOK_PAD * IN_PAD + IN_PAD * HID_PAD
                         + HID_PAD * HID_PAD + HID_PAD * OUT_PAD)
    weight_bytes = 2 * (TOK_PAD * IN_PAD + IN_PAD * HID_PAD
                        + HID_PAD * HID_PAD + HID_PAD * OUT_PAD)    # bf16
    bias_bytes = 4 * (IN_PAD + HID_PAD + HID_PAD + OUT_PAD)         # f32
    bytes_accessed = b_pad * (TOK_PAD + OUT_PAD) * 4 + weight_bytes + bias_bytes

    out = pl.pallas_call(
        qmodel_kernel,
        out_shape=jax.ShapeDtypeStruct((b_pad, OUT_PAD), jnp.float32),
        grid=grid,
        in_specs=[
            pl.BlockSpec((1, IN_PAD), resident),            # cls pattern (f32)
            pl.BlockSpec((TOK_PAD, IN_PAD), resident),      # replication (bf16)
            pl.BlockSpec((tile_b, TOK_PAD), batch_tile),    # token ids (int32)
            pl.BlockSpec((IN_PAD, HID_PAD), resident),      # w1 (emb-fused, bf16)
            pl.BlockSpec((1, HID_PAD), resident),           # b1 (f32)
            pl.BlockSpec((HID_PAD, HID_PAD), resident),     # w2 (bf16)
            pl.BlockSpec((1, HID_PAD), resident),           # b2 (f32)
            pl.BlockSpec((HID_PAD, OUT_PAD), resident),     # w3 (bf16)
            pl.BlockSpec((1, OUT_PAD), resident),           # b3 (f32)
        ],
        out_specs=pl.BlockSpec((tile_b, OUT_PAD), batch_tile),
        compiler_params=pltpu.CompilerParams(
            dimension_semantics=("parallel",),      # v7x: shard batch over 2 TCs
            vmem_limit_bytes=32 * 1024 * 1024,      # plenty even at tile_b=1024
        ),
        cost_estimate=pl.CostEstimate(flops=flops, transcendentals=0,
                                      bytes_accessed=bytes_accessed),
    )(kparams["cls"], kparams["rep"], tok,
      kparams["w1"], kparams["b1"], kparams["w2"], kparams["b2"],
      kparams["w3"], kparams["b3"])

    return out[:B, :OUT_F]


def init_params(key):
    """Deterministic init mimicking PyTorch defaults (shapes from __init__)."""
    ks = jax.random.split(key, 7)

    def linear(kw, kb, fan_in, fan_out):
        bound = 1.0 / jnp.sqrt(fan_in)
        # PyTorch stores (out, in); we transpose to (in, out) for x @ W.
        w = jax.random.uniform(kw, (fan_out, fan_in), jnp.float32, -bound, bound).T
        b = jax.random.uniform(kb, (1, fan_out), jnp.float32, -bound, bound)
        return w, b

    emb = jax.random.normal(ks[0], (VOCAB, EMB_D), jnp.float32)   # Embedding(3, 3)
    w1, b1 = linear(ks[1], ks[2], IN_F, HID_F)                    # Linear(30, 300)
    w2, b2 = linear(ks[3], ks[4], HID_F, HID_F)                   # Linear(300, 300)
    w3, b3 = linear(ks[5], ks[6], HID_F, OUT_F)                   # Linear(300, 9)
    return {"embedding": emb, "w1": w1, "b1": b1,
            "w2": w2, "b2": b2, "w3": w3, "b3": b3}


def reference_forward(states, params):
    """Pure-JAX f32 reference of the original forward pass."""
    B = states.shape[0]
    x = jnp.take(params["embedding"], states, axis=0)            # (B, 10, 3)
    x = jax.nn.relu(x).reshape(B, IN_F)
    x = jax.nn.relu(x @ params["w1"] + params["b1"])
    x = jax.nn.relu(x @ params["w2"] + params["b2"])
    return x @ params["w3"] + params["b3"]


if __name__ == "__main__":
    key = jax.random.PRNGKey(0)
    kp, ks_small, ks_large = jax.random.split(key, 3)
    params = init_params(kp)
    kparams = prepare_kernel_params(params)   # one-time host-side fold + pad

    # Small batch (single minimal tile) and a >256 batch (2-step grid path).
    for B, ks in ((4, ks_small), (260, ks_large)):
        states = jax.random.randint(ks, (B, N_TOK), 0, VOCAB, dtype=jnp.int32)

        out = jax.block_until_ready(qmodel_forward(states, kparams))
        ref = reference_forward(states, params)

        assert out.shape == (B, OUT_F), out.shape
        max_err = float(jnp.max(jnp.abs(out - ref)))
        # bf16 weights/activations (f32 accumulation) vs pure-f32 reference:
        # observed error is O(1e-3); tolerance leaves comfortable margin.
        assert jnp.allclose(out, ref, atol=2e-2, rtol=2e-2), \
            f"B={B} mismatch, max_err={max_err}"

    print("KERNEL_OK")
</pallas_src>

<mosaic_0001>
module attributes {stable_mosaic.version = 11 : i64} {
  func.func @qmodel_kernel(%arg0: i32, %arg1: memref<1x128xf32, #tpu.memory_space<vmem>>, %arg2: memref<16x128xbf16, #tpu.memory_space<vmem>>, %arg3: memref<8x16xi32, #tpu.memory_space<vmem>>, %arg4: memref<128x384xbf16, #tpu.memory_space<vmem>>, %arg5: memref<1x384xf32, #tpu.memory_space<vmem>>, %arg6: memref<384x384xbf16, #tpu.memory_space<vmem>>, %arg7: memref<1x384xf32, #tpu.memory_space<vmem>>, %arg8: memref<384x128xbf16, #tpu.memory_space<vmem>>, %arg9: memref<1x128xf32, #tpu.memory_space<vmem>>, %arg10: memref<8x128xf32, #tpu.memory_space<vmem>>) attributes {dimension_semantics = [#tpu.dimension_semantics<parallel>], iteration_bounds = array<i64: 1>, scalar_prefetch = 0 : i64, scratch_operands = 0 : i64, tpu.core_type = #tpu.core_type<tc>, window_params = [{pipeline_mode = #tpu.pipeline_mode<synchronous>, transform_indices = @transform_0, window_bounds = array<i64: 1, 128>}, {pipeline_mode = #tpu.pipeline_mode<synchronous>, transform_indices = @transform_1, window_bounds = array<i64: 16, 128>}, {transform_indices = @transform_2, window_bounds = array<i64: 8, 16>}, {pipeline_mode = #tpu.pipeline_mode<synchronous>, transform_indices = @transform_3, window_bounds = array<i64: 128, 384>}, {pipeline_mode = #tpu.pipeline_mode<synchronous>, transform_indices = @transform_4, window_bounds = array<i64: 1, 384>}, {pipeline_mode = #tpu.pipeline_mode<synchronous>, transform_indices = @transform_5, window_bounds = array<i64: 384, 384>}, {pipeline_mode = #tpu.pipeline_mode<synchronous>, transform_indices = @transform_6, window_bounds = array<i64: 1, 384>}, {pipeline_mode = #tpu.pipeline_mode<synchronous>, transform_indices = @transform_7, window_bounds = array<i64: 384, 128>}, {pipeline_mode = #tpu.pipeline_mode<synchronous>, transform_indices = @transform_8, window_bounds = array<i64: 1, 128>}, {transform_indices = @transform_9, window_bounds = array<i64: 8, 128>}]} {
    %c0 = arith.constant 0 : index
    %c0_0 = arith.constant 0 : index
    %0 = vector.load %arg3[%c0, %c0_0] : memref<8x16xi32, #tpu.memory_space<vmem>>, vector<8x16xi32>
    %1 = arith.sitofp %0 : vector<8x16xi32> to vector<8x16xbf16>
    %c0_1 = arith.constant 0 : index
    %c0_2 = arith.constant 0 : index
    %2 = vector.load %arg2[%c0_1, %c0_2] : memref<16x128xbf16, #tpu.memory_space<vmem>>, vector<16x128xbf16>
    %cst = arith.constant dense<0.000000e+00> : vector<8x128xf32>
    %3 = tpu.matmul %1, %2, %cst {dimension_numbers = #tpu.dot_dimension_numbers<[1], [0], [0], [1], [0, 0, 1, 1], [], []>} : vector<8x16xbf16>, vector<16x128xbf16>, vector<8x128xf32> -> vector<8x128xf32>
    %c0_3 = arith.constant 0 : index
    %c0_4 = arith.constant 0 : index
    %4 = vector.load %arg1[%c0_3, %c0_4] : memref<1x128xf32, #tpu.memory_space<vmem>>, vector<1x128xf32>
    %5 = vector.broadcast %4 : vector<1x128xf32> to vector<8x128xf32>
    %6 = arith.cmpf oeq, %3, %5 : vector<8x128xf32>
    %7 = arith.extui %6 : vector<8x128xi1> to vector<8x128xi32>
    %8 = arith.sitofp %7 : vector<8x128xi32> to vector<8x128xf32>
    %9 = arith.truncf %8 : vector<8x128xf32> to vector<8x128xbf16>
    %c0_5 = arith.constant 0 : index
    %c0_6 = arith.constant 0 : index
    %10 = vector.load %arg4[%c0_5, %c0_6] : memref<128x384xbf16, #tpu.memory_space<vmem>>, vector<128x384xbf16>
    %cst_7 = arith.constant dense<0.000000e+00> : vector<8x384xf32>
    %11 = tpu.matmul %9, %10, %cst_7 {dimension_numbers = #tpu.dot_dimension_numbers<[1], [0], [0], [1], [0, 0, 1, 1], [], []>} : vector<8x128xbf16>, vector<128x384xbf16>, vector<8x384xf32> -> vector<8x384xf32>
    %c0_8 = arith.constant 0 : index
    %c0_9 = arith.constant 0 : index
    %12 = vector.load %arg5[%c0_8, %c0_9] : memref<1x384xf32, #tpu.memory_space<vmem>>, vector<1x384xf32>
    %13 = vector.broadcast %12 : vector<1x384xf32> to vector<8x384xf32>
    %14 = arith.addf %11, %13 : vector<8x384xf32>
    %cst_10 = arith.constant 0.000000e+00 : f32
    %15 = vector.broadcast %cst_10 : f32 to vector<8x384xf32>
    %16 = arith.maximumf %14, %15 : vector<8x384xf32>
    %17 = arith.truncf %16 : vector<8x384xf32> to vector<8x384xbf16>
    %c0_11 = arith.constant 0 : index
    %c0_12 = arith.constant 0 : index
    %18 = vector.load %arg6[%c0_11, %c0_12] : memref<384x384xbf16, #tpu.memory_space<vmem>>, vector<384x384xbf16>
    %cst_13 = arith.constant dense<0.000000e+00> : vector<8x384xf32>
    %19 = tpu.matmul %17, %18, %cst_13 {dimension_numbers = #tpu.dot_dimension_numbers<[1], [0], [0], [1], [0, 0, 1, 1], [], []>} : vector<8x384xbf16>, vector<384x384xbf16>, vector<8x384xf32> -> vector<8x384xf32>
    %c0_14 = arith.constant 0 : index
    %c0_15 = arith.constant 0 : index
    %20 = vector.load %arg7[%c0_14, %c0_15] : memref<1x384xf32, #tpu.memory_space<vmem>>, vector<1x384xf32>
    %21 = vector.broadcast %20 : vector<1x384xf32> to vector<8x384xf32>
    %22 = arith.addf %19, %21 : vector<8x384xf32>
    %cst_16 = arith.constant 0.000000e+00 : f32
    %23 = vector.broadcast %cst_16 : f32 to vector<8x384xf32>
    %24 = arith.maximumf %22, %23 : vector<8x384xf32>
    %25 = arith.truncf %24 : vector<8x384xf32> to vector<8x384xbf16>
    %c0_17 = arith.constant 0 : index
    %c0_18 = arith.constant 0 : index
    %26 = vector.load %arg8[%c0_17, %c0_18] : memref<384x128xbf16, #tpu.memory_space<vmem>>, vector<384x128xbf16>
    %cst_19 = arith.constant dense<0.000000e+00> : vector<8x128xf32>
    %27 = tpu.matmul %25, %26, %cst_19 {dimension_numbers = #tpu.dot_dimension_numbers<[1], [0], [0], [1], [0, 0, 1, 1], [], []>} : vector<8x384xbf16>, vector<384x128xbf16>, vector<8x128xf32> -> vector<8x128xf32>
    %c0_20 = arith.constant 0 : index
    %c0_21 = arith.constant 0 : index
    %28 = vector.load %arg9[%c0_20, %c0_21] : memref<1x128xf32, #tpu.memory_space<vmem>>, vector<1x128xf32>
    %29 = vector.broadcast %28 : vector<1x128xf32> to vector<8x128xf32>
    %30 = arith.addf %27, %29 : vector<8x128xf32>
    %c0_22 = arith.constant 0 : index
    %c0_23 = arith.constant 0 : index
    %31 = vector.load %arg10[%c0_22, %c0_23] : memref<8x128xf32, #tpu.memory_space<vmem>>, vector<8x128xf32>
    tpu.vector_store %arg10[%c0_22, %c0_23], %30 {strides = array<i32>} : memref<8x128xf32, #tpu.memory_space<vmem>>, vector<8x128xf32>,
    return
  }
  func.func @transform_0(%arg0: i32) -> (i32, i32) {
    %c0_i32 = arith.constant 0 : i32
    %c0_i32_0 = arith.constant 0 : i32
    %c0_i32_1 = arith.constant 0 : i32
    return %c0_i32, %c0_i32_0 : i32, i32
  }
  func.func @transform_1(%arg0: i32) -> (i32, i32) {
    %c0_i32 = arith.constant 0 : i32
    %c0_i32_0 = arith.constant 0 : i32
    %c0_i32_1 = arith.constant 0 : i32
    return %c0_i32, %c0_i32_0 : i32, i32
  }
  func.func @transform_2(%arg0: i32) -> (i32, i32) {
    %c0_i32 = arith.constant 0 : i32
    %c0_i32_0 = arith.constant 0 : i32
    return %arg0, %c0_i32 : i32, i32
  }
  func.func @transform_3(%arg0: i32) -> (i32, i32) {
    %c0_i32 = arith.constant 0 : i32
    %c0_i32_0 = arith.constant 0 : i32
    %c0_i32_1 = arith.constant 0 : i32
    return %c0_i32, %c0_i32_0 : i32, i32
  }
  func.func @transform_4(%arg0: i32) -> (i32, i32) {
    %c0_i32 = arith.constant 0 : i32
    %c0_i32_0 = arith.constant 0 : i32
    %c0_i32_1 = arith.constant 0 : i32
    return %c0_i32, %c0_i32_0 : i32, i32
  }
  func.func @transform_5(%arg0: i32) -> (i32, i32) {
    %c0_i32 = arith.constant 0 : i32
    %c0_i32_0 = arith.constant 0 : i32
    %c0_i32_1 = arith.constant 0 : i32
    return %c0_i32, %c0_i32_0 : i32, i32
  }
  func.func @transform_6(%arg0: i32) -> (i32, i32) {
    %c0_i32 = arith.constant 0 : i32
    %c0_i32_0 = arith.constant 0 : i32
    %c0_i32_1 = arith.constant 0 : i32
    return %c0_i32, %c0_i32_0 : i32, i32
  }
  func.func @transform_7(%arg0: i32) -> (i32, i32) {
    %c0_i32 = arith.constant 0 : i32
    %c0_i32_0 = arith.constant 0 : i32
    %c0_i32_1 = arith.constant 0 : i32
    return %c0_i32, %c0_i32_0 : i32, i32
  }
  func.func @transform_8(%arg0: i32) -> (i32, i32) {
    %c0_i32 = arith.constant 0 : i32
    %c0_i32_0 = arith.constant 0 : i32
    %c0_i32_1 = arith.constant 0 : i32
    return %c0_i32, %c0_i32_0 : i32, i32
  }
  func.func @transform_9(%arg0: i32) -> (i32, i32) {
    %c0_i32 = arith.constant 0 : i32
    %c0_i32_0 = arith.constant 0 : i32
    return %arg0, %c0_i32 : i32, i32
  }
}

</mosaic_0001>

<bundles_post_ra>
// kernel: tpu_custom_call.1
= control target key start
LH: loop header
LB: loop body
LE: loop exit
PB: predicated region body
PF: predicated region fallthrough
CT: control target
= control target key end

     0   :  { %14 = vsyncpa [#allocation3], 0  ;;  %s2243_s0 = inlined_call_operand.hbm [shape: f32[1,128], index: 0, kind: input, shape index: {}]   ;;  %s2244_s1 = inlined_call_operand.hbm [shape: bf16[16,128], index: 1, kind: input, shape index: {}]   ;;  %s2245_s2 = inlined_call_operand.hbm [shape: s32[8,16], index: 2, kind: input, shape index: {}]   ;;  %s2246_s3 = inlined_call_operand.hbm [shape: bf16[128,384], index: 3, kind: input, shape index: {}]   ;;  %s2247_s4 = inlined_call_operand.vmem [shape: f32[1,384], index: 4, kind: input, shape index: {}]   ;;  %s2248_s5 = inlined_call_operand.hbm [shape: bf16[384,384], index: 5, kind: input, shape index: {}]   ;;  %s2249_s6 = inlined_call_operand.vmem [shape: f32[1,384], index: 6, kind: input, shape index: {}]   ;;  %s2250_s7 = inlined_call_operand.hbm [shape: bf16[384,128], index: 7, kind: input, shape index: {}]   ;;  %s2251_s8 = inlined_call_operand.vmem [shape: f32[1,128], index: 8, kind: input, shape index: {}]   ;;  %s2252_s9 = inlined_call_operand.hbm [shape: f32[8,128], index: 9, kind: output, shape index: {}]  }
   0x1   :  { %15 = vsyncpa [#allocation6], 0 }
   0x2   :  { %16 = vsyncpa [#allocation9], 0 }
   0x3   :  { %17 = vsyncpa [#allocation12], 0 }
   0x4   :  { %18 = vsyncpa [#allocation4], 0  ;;  %s2011_s30 = smov [#allocation5]   ;;  %s1847_s13 = scalar_lea.hbm %s2244_s1, 128 }
   0x5   :  { %s34_s10 = sshll.u32 %s2011_s30, 4  ;;  %p1848_p0 = scmp.ne.s32.totalorder %s2244_s1, %s1847_s13  ;;  %s35_s10 = int_to_ptr.vmem [resolvable:$true] %s34_s10 }
   0x6   :  { %p1851_p1 = scmp.lt.u32.totalorder %s1847_s13, %s2244_s1 }
   0x8   :  { %p1853_p2 = pnand %p1851_p1, %p1848_p0 }
   0xa   :  { %1856 = shalt.err (!%p1853_p2)
}
   0xb   :  { %s1857_s18 = scalar_lea.vmem %s35_s10, 128  ;;  %p1862_p4 = scmp.lt.s32.totalorder %s35_s10, %s35_s10 }
   0xc   :  { %p1858_p3 = scmp.ne.s32.totalorder %s35_s10, %s1857_s18  ;;  %p1863_p5 = scmp.lt.s32.totalorder %s1857_s18, %s1857_s18 }
   0xe   :  { %p1864_p6 = por %p1863_p5, %p1862_p4 }
  0x10   :  { %p1865_p7 = pnand %p1864_p6, %p1858_p3 }
  0x12   :  { %1868 = shalt.err (!%p1865_p7)
}
  0x13   :  { %s2012_s19 = smov 64   ;;  %s2013_s20 = smov 4  }
  0x14   :  { %40 = dma.hbm_to_vmem [thread:$0]  %s2244_s1, 128, %s35_s10, [#allocation6], %s2012_s19, %s2012_s19, %s2013_s20  }
  0x15   :  { %s2014_s23 = smov [#allocation8]   ;;  %s1869_s27 = scalar_lea.hbm %s2246_s3, 3072 }
  0x16   :  { %s56_s24 = sshll.u32 %s2014_s23, 4  ;;  %p1870_p8 = scmp.ne.s32.totalorder %s2246_s3, %s1869_s27  ;;  %s57_s24 = int_to_ptr.vmem [resolvable:$true] %s56_s24 }
  0x17   :  { %p1873_p9 = scmp.lt.u32.totalorder %s1869_s27, %s2246_s3 }
  0x19   :  { %p1875_p10 = pnand %p1873_p9, %p1870_p8 }
  0x1b   :  { %1878 = shalt.err (!%p1875_p10)
}
  0x1c   :  { %s1879_s12 = scalar_lea.vmem %s57_s24, 3072  ;;  %p1884_p12 = scmp.lt.s32.totalorder %s57_s24, %s57_s24 }
  0x1d   :  { %p1880_p11 = scmp.ne.s32.totalorder %s57_s24, %s1879_s12  ;;  %p1885_p13 = scmp.lt.s32.totalorder %s1879_s12, %s1879_s12 }
  0x1f   :  { %p1886_p0 = por %p1885_p13, %p1884_p12 }
  0x21   :  { %p1887_p1 = pnand %p1886_p0, %p1880_p11 }
  0x23   :  { %1890 = shalt.err (!%p1887_p1)
}
  0x24   :  { %s2015_s1 = smov 192   ;;  %s2016_s10 = smov 12  }
  0x25   :  { %62 = dma.hbm_to_vmem [thread:$0]  %s2246_s3, 3072, %s57_s24, [#allocation9], %s2015_s1, %s2015_s1, %s2016_s10  }
  0x26   :  { %s2017_s15 = smov [#allocation2]   ;;  %s2018_s17 = smov [#allocation7]  }
  0x27   :  { %s25_s16 = sshll.u32 %s2017_s15, 4  ;;  %s47_s18 = sshll.u32 %s2018_s17, 4  ;;  %s26_s16 = int_to_ptr.vmem [resolvable:$true] %s25_s16  ;;  %s48_s18 = int_to_ptr.vmem [resolvable:$true] %s47_s18 }
  0x28   :  { %s1891_s23 = scalar_lea.hbm %s2243_s0, 16 }
  0x29   :  { %p1892_p2 = scmp.ne.s32.totalorder %s2243_s0, %s1891_s23  ;;  %p1895_p3 = scmp.lt.u32.totalorder %s1891_s23, %s2243_s0 }
  0x2b   :  { %p1897_p4 = pnand %p1895_p3, %p1892_p2 }
  0x2d   :  { %1900 = shalt.err (!%p1897_p4)
}
  0x2e   :  { %s1901_s3 = scalar_lea.vmem %s26_s16, 16  ;;  %s1905_s24 = scalar_lea.vmem %s26_s16, 32 }
  0x2f   :  { %p1902_p5 = scmp.ne.s32.totalorder %s26_s16, %s1901_s3  ;;  %p1906_p6 = scmp.lt.s32.totalorder %s26_s16, %s26_s16 }
  0x30   :  { %p1907_p7 = scmp.lt.s32.totalorder %s1905_s24, %s1901_s3 }
  0x32   :  { %p1908_p8 = por %p1907_p7, %p1906_p6 }
  0x34   :  { %p1909_p9 = pnand %p1908_p8, %p1902_p5 }
  0x36   :  { %1912 = shalt.err (!%p1909_p9)
}
  0x37   :  { %28 = dma.hbm_to_vmem [thread:$0]  %s2243_s0, 16, %s26_s16, [#allocation3]  }
  0x38   :  { %s1913_s13 = scalar_lea.hbm %s2245_s2, 128 }
  0x39   :  { %p1914_p10 = scmp.ne.s32.totalorder %s2245_s2, %s1913_s13  ;;  %p1917_p11 = scmp.lt.u32.totalorder %s1913_s13, %s2245_s2 }
  0x3b   :  { %p1919_p12 = pnand %p1917_p11, %p1914_p10 }
  0x3d   :  { %1922 = shalt.err (!%p1919_p12)
}
  0x3e   :  { %s1923_s22 = scalar_lea.vmem %s48_s18, 128  ;;  %p1928_p0 = scmp.lt.s32.totalorder %s48_s18, %s48_s18 }
  0x3f   :  { %p1924_p13 = scmp.ne.s32.totalorder %s48_s18, %s1923_s22  ;;  %p1929_p1 = scmp.lt.s32.totalorder %s1923_s22, %s1923_s22 }
  0x41   :  { %p1930_p2 = por %p1929_p1, %p1928_p0 }
  0x43   :  { %p1931_p3 = pnand %p1930_p2, %p1924_p13 }
  0x45   :  { %1934 = shalt.err (!%p1931_p3)
}
  0x46   :  { %50 = dma.hbm_to_vmem [thread:$0]  %s2245_s2, 128, %s48_s18, [#allocation6]  }
  0x47   :  { %s2019_s23 = smov [#allocation10]   ;;  %s2020_s26 = smov [#allocation11]  }
  0x48   :  { %s70_s25 = sshll.u32 %s2019_s23, 4  ;;  %s84_s27 = sshll.u32 %s2020_s26, 4  ;;  %s71_s25 = int_to_ptr.vmem [resolvable:$true] %s70_s25  ;;  %s2130_s27 = int_to_ptr.vmem [resolvable:$true] %s84_s27 }
  0x49   :  { %s1935_s24 = scalar_lea.hbm %s2248_s5, 9216 }
  0x4a   :  { %p1936_p4 = scmp.ne.s32.totalorder %s2248_s5, %s1935_s24  ;;  %p1939_p5 = scmp.lt.u32.totalorder %s1935_s24, %s2248_s5 }
  0x4c   :  { %p1941_p6 = pnand %p1939_p5, %p1936_p4 }
  0x4e   :  { %1944 = shalt.err (!%p1941_p6)
}
  0x4f   :  { %s1945_s2 = scalar_lea.vmem %s71_s25, 9216  ;;  %p1950_p8 = scmp.lt.s32.totalorder %s71_s25, %s71_s25 }
  0x50   :  { %p1946_p7 = scmp.ne.s32.totalorder %s71_s25, %s1945_s2  ;;  %p1951_p9 = scmp.lt.s32.totalorder %s1945_s2, %s1945_s2 }
  0x52   :  { %p1952_p10 = por %p1951_p9, %p1950_p8 }
  0x54   :  { %p1953_p11 = pnand %p1952_p10, %p1946_p7 }
  0x56   :  { %1956 = shalt.err (!%p1953_p11)
}
  0x57   :  { %76 = dma.hbm_to_vmem [thread:$0]  %s2248_s5, 9216, %s71_s25, [#allocation9], %s2015_s1, %s2015_s1, %s2016_s10  }
  0x58   :  { %s1957_s17 = scalar_lea.hbm %s2250_s7, 3072 }
  0x59   :  { %p1958_p12 = scmp.ne.s32.totalorder %s2250_s7, %s1957_s17  ;;  %p1961_p13 = scmp.lt.u32.totalorder %s1957_s17, %s2250_s7 }
  0x5b   :  { %p1963_p0 = pnand %p1961_p13, %p1958_p12 }
  0x5d   :  { %1966 = shalt.err (!%p1963_p0)
}
  0x5e   :  { %s1967_s23 = scalar_lea.vmem %s2130_s27, 3072  ;;  %p1972_p2 = scmp.lt.s32.totalorder %s2130_s27, %s2130_s27 }
  0x5f   :  { %p1968_p1 = scmp.ne.s32.totalorder %s2130_s27, %s1967_s23  ;;  %p1973_p3 = scmp.lt.s32.totalorder %s1967_s23, %s1967_s23 }
  0x61   :  { %p1974_p4 = por %p1973_p3, %p1972_p2 }
  0x63   :  { %p1975_p5 = pnand %p1974_p4, %p1968_p1 }
  0x65   :  { %1978 = shalt.err (!%p1975_p5)
}
  0x66   :  { %90 = dma.hbm_to_vmem [thread:$0]  %s2250_s7, 3072, %s2130_s27, [#allocation12], %s2012_s19, %s2012_s19, %s2013_s20  }
  0x67   :  { %2001 = dma.done.wait [#allocation3], 16  }
  0x68   :  { %2002 = vsyncadd [#allocation3], 4294967280 }
  0x69   :  { %2003 = dma.done.wait [#allocation6], 256  }
  0x6a   :  { %2004 = vsyncadd [#allocation6], 4294967040 }
  0x6b   :  { %2005 = dma.done.wait [#allocation9], 12288  }
  0x6c   :  { %2006 = vsyncadd [#allocation9], 4294955008 }
  0x6d   :  { %2007 = dma.done.wait [#allocation12], 3072  }
  0x6e   :  { %2008 = vsyncadd [#allocation12], 4294964224  ;;  %v2021_v0 = vmov 0.0   ;;  %vm2022_vm0 = vmmov 0   ;;  %v1694_v1 = vld [vmem:[#allocation5] sm:$0xff]   ;;  %v112_v2 = vld [vmem:[#allocation7] sm:$0xff] }
  0x6f   :  { %1607 = vmatprep.subr.bf16.mxu0 %v2021_v0  ;;  %1609 = vmatprep.mubr.msk.bf16.mxu0 %vm2022_vm0, %v2021_v0  ;;  %v113_v3 = vcvt.s32.f32 %v112_v2  ;;  %v1695_v4 = vld [vmem:[#allocation8 + $0x4] ss:$12 sps:$4 sm:$0xff]   ;;  %v1697_v5 = vld [vmem:[#allocation8] ss:$12 sps:$4 sm:$0xff]   ;;  %vm123_vm1 = vcmask 130048   ;;  %v2023_v29 = vmov 0  }
  0x70   :  { %1608 = vmatpush3.bf16.msra.mxu0 %v1694_v1  ;;  %v1698_v6 = vld [vmem:[#allocation8 + $0x8] ss:$12 sps:$4 sm:$0xff]   ;;  %355 = vmatprep.subr.bf16.mxu1 %v1695_v4  ;;  %v1701_v9 = vld [vmem:[#allocation8 + $0x18] ss:$12 sps:$4 sm:$0xff]   ;;  %v1702_v11 = vld [vmem:[#allocation8 + $0x20] ss:$12 sps:$4 sm:$0xff]  }
  0x71   :  { %1613 = vmatprep.subr.bf16.mxu0 %v2021_v0  ;;  %v114_v7 = vpack.c.bf16 %v113_v3, %v113_v3  ;;  %v1699_v8 = vld [vmem:[#allocation8 + $0x1c] ss:$12 sps:$4 sm:$0xff]   ;;  %356 = vmatpush1.bf16.msra.mxu1 %v1697_v5  ;;  %v1703_v10 = vld [vmem:[#allocation8 + $0x34] ss:$12 sps:$4 sm:$0xff]   ;;  %v1707_v13 = vld [vmem:[#allocation8 + $0x4c] ss:$12 sps:$4 sm:$0xff]  }
  0x72   :  { %357 = vmatprep.subr.bf16.mxu1 %v1699_v8  ;;  %v1705_v12 = vld [vmem:[#allocation8 + $0x30] ss:$12 sps:$4 sm:$0xff]   ;;  %v1706_v14 = vld [vmem:[#allocation8 + $0x38] ss:$12 sps:$4 sm:$0xff]   ;;  %v1709_v15 = vld [vmem:[#allocation8 + $0x48] ss:$12 sps:$4 sm:$0xff]   ;;  %387 = vmatprep.mubr.bf16.mxu1 %v2023_v29 }
  0x73   :  { %1610 = vmatmul.mubr.msk.bf16.vlgmr.msra.gmra.mrb[0].mxu0 %vm123_vm1, %v114_v7  ;;  %v1711_v16 = vld [vmem:[#allocation8 + $0x64] ss:$12 sps:$4 sm:$0xff]   ;;  %v1713_v18 = vld [vmem:[#allocation8 + $0x60] ss:$12 sps:$4 sm:$0xff]   ;;  %v1714_v19 = vld [vmem:[#allocation8 + $0x68] ss:$12 sps:$4 sm:$0xff]  }
  0x74   :  { %1614 = vmatpush3.bf16.msra.mxu0 %v1698_v6  ;;  %1629 = vmatprep.mubr.msk.bf16.mxu0 %vm2022_vm0, %v2021_v0  ;;  %v1710_v17 = vld [vmem:[#allocation8 + $0x50] ss:$12 sps:$4 sm:$0xff]   ;;  %v1717_v21 = vld [vmem:[#allocation8 + $0x78] ss:$12 sps:$4 sm:$0xff]   ;;  %v1719_v22 = vld [vmem:[#allocation8 + $0x94] ss:$12 sps:$4 sm:$0xff]  }
  0x75   :  { %1615 = vmatprep.subr.bf16.mxu0 %v2021_v0  ;;  %358 = vmatpush1.bf16.msra.mxu1 %v1701_v9  ;;  %v1715_v20 = vld [vmem:[#allocation8 + $0x7c] ss:$12 sps:$4 sm:$0xff]   ;;  %v1718_v23 = vld [vmem:[#allocation8 + $0x80] ss:$12 sps:$4 sm:$0xff]   ;;  %v1722_v26 = vld [vmem:[#allocation8 + $0x98] ss:$12 sps:$4 sm:$0xff]  }
  0x76   :  { %359 = vmatprep.subr.bf16.mxu1 %v1703_v10  ;;  %v1721_v24 = vld [vmem:[#allocation8 + $0x90] ss:$12 sps:$4 sm:$0xff]   ;;  %v1723_v25 = vld [vmem:[#allocation8 + $0xac] ss:$12 sps:$4 sm:$0xff]   ;;  %v1725_v27 = vld [vmem:[#allocation8 + $0xa8] ss:$12 sps:$4 sm:$0xff]  }
  0x77   :  { %v1726_v28 = vld [vmem:[#allocation8 + $0xb0] ss:$12 sps:$4 sm:$0xff]   ;;  %v1754_v31 = vld [vmem:[#allocation10 + $0xc8] ss:$12 sps:$4 sm:$0xff]   ;;  %v1407_v32 = vld [vmem:[#allocation2] ss:$0 sm:$0xff] }
  0x78   :  { %1616 = vmatpush3.bf16.msra.mxu0 %v1702_v11  ;;  %v1729_v30 = vld [vmem:[#allocation10 + $0x4] ss:$12 sps:$4 sm:$0xff]   ;;  %v1727_v34 = vld [vmem:[#allocation10] ss:$12 sps:$4 sm:$0xff]   ;;  %v1755_v35 = vld [vmem:[#allocation10 + $0x8] ss:$12 sps:$4 sm:$0xff]  }
  0x79   :  { %1617 = vmatprep.subr.bf16.mxu0 %v2021_v0  ;;  %360 = vmatpush1.bf16.msra.mxu1 %v1705_v12  ;;  %v1732_v37 = vld [vmem:[#allocation10 + $0x1c] ss:$12 sps:$4 sm:$0xff]   ;;  %v1759_v38 = vld [vmem:[#allocation10 + $0xe0] ss:$12 sps:$4 sm:$0xff]   ;;  %v2024_v41 = vmov 1.0|1.0  }
  0x7a   :  { %361 = vmatprep.subr.bf16.mxu1 %v1707_v13  ;;  %v1730_v42 = vld [vmem:[#allocation10 + $0x18] ss:$12 sps:$4 sm:$0xff]   ;;  %v1760_v43 = vld [vmem:[#allocation10 + $0x20] ss:$12 sps:$4 sm:$0xff]   ;;  %v1733_v46 = vld [vmem:[#allocation10 + $0x30] ss:$12 sps:$4 sm:$0xff]  }
  0x7b   :  { %v1735_v44 = vld [vmem:[#allocation10 + $0x34] ss:$12 sps:$4 sm:$0xff]   ;;  %v1764_v45 = vld [vmem:[#allocation10 + $0xf8] ss:$12 sps:$4 sm:$0xff]   ;;  %v1769_v49 = vld [vmem:[#allocation10 + $0x110] ss:$12 sps:$4 sm:$0xff]  }
  0x7c   :  { %1618 = vmatpush3.bf16.msra.mxu0 %v1706_v14  ;;  %v1765_v47 = vld [vmem:[#allocation10 + $0x38] ss:$12 sps:$4 sm:$0xff]   ;;  %v1736_v50 = vld [vmem:[#allocation10 + $0x48] ss:$12 sps:$4 sm:$0xff]   ;;  %v1770_v51 = vld [vmem:[#allocation10 + $0x50] ss:$12 sps:$4 sm:$0xff]  }
  0x7d   :  { %1619 = vmatprep.subr.bf16.mxu0 %v2021_v0  ;;  %362 = vmatpush1.bf16.msra.mxu1 %v1709_v15  ;;  %v1738_v48 = vld [vmem:[#allocation10 + $0x4c] ss:$12 sps:$4 sm:$0xff]   ;;  %v1741_v52 = vld [vmem:[#allocation10 + $0x64] ss:$12 sps:$4 sm:$0xff]   ;;  %v1774_v53 = vld [vmem:[#allocation10 + $0x128] ss:$12 sps:$4 sm:$0xff]  }
  0x7e   :  { %363 = vmatprep.subr.bf16.mxu1 %v1711_v16  ;;  %v1739_v54 = vld [vmem:[#allocation10 + $0x60] ss:$12 sps:$4 sm:$0xff]   ;;  %v1775_v55 = vld [vmem:[#allocation10 + $0x68] ss:$12 sps:$4 sm:$0xff]   ;;  %v1742_v58 = vld [vmem:[#allocation10 + $0x78] ss:$12 sps:$4 sm:$0xff]  }
  0x7f   :  { %v1744_v56 = vld [vmem:[#allocation10 + $0x7c] ss:$12 sps:$4 sm:$0xff]   ;;  %v1779_v57 = vld [vmem:[#allocation10 + $0x140] ss:$12 sps:$4 sm:$0xff]   ;;  %v1753_v1 = vld [vmem:[#allocation10 + $0xc4] ss:$12 sps:$4 sm:$0xff]  }
  0x80   :  { %1620 = vmatpush3.bf16.msra.mxu0 %v1710_v17  ;;  %v1780_v59 = vld [vmem:[#allocation10 + $0x80] ss:$12 sps:$4 sm:$0xff]   ;;  %v1745_v61 = vld [vmem:[#allocation10 + $0x90] ss:$12 sps:$4 sm:$0xff]   ;;  %v1748_v63 = vld [vmem:[#allocation10 + $0xa8] ss:$12 sps:$4 sm:$0xff]  }
  0x81   :  { %1621 = vmatprep.subr.bf16.mxu0 %v2021_v0  ;;  %364 = vmatpush1.bf16.msra.mxu1 %v1713_v18  ;;  %v1747_v60 = vld [vmem:[#allocation10 + $0x94] ss:$12 sps:$4 sm:$0xff]   ;;  %v1750_v62 = vld [vmem:[#allocation10 + $0xac] ss:$12 sps:$4 sm:$0xff]   ;;  %v1758_v3 = vld [vmem:[#allocation10 + $0xdc] ss:$12 sps:$4 sm:$0xff]  }
  0x82   :  { %365 = vmatprep.subr.bf16.mxu1 %v1715_v20  ;;  %v1751_v2 = vld [vmem:[#allocation10 + $0xc0] ss:$12 sps:$4 sm:$0xff]   ;;  %v1756_v4 = vld [vmem:[#allocation10 + $0xd8] ss:$12 sps:$4 sm:$0xff]   ;;  %v1761_v6 = vld [vmem:[#allocation10 + $0xf0] ss:$12 sps:$4 sm:$0xff]  }
  0x83   :  { %v1763_v5 = vld [vmem:[#allocation10 + $0xf4] ss:$12 sps:$4 sm:$0xff]   ;;  %v1768_v7 = vld [vmem:[#allocation10 + $0x10c] ss:$12 sps:$4 sm:$0xff]   ;;  %v1773_v9 = vld [vmem:[#allocation10 + $0x124] ss:$12 sps:$4 sm:$0xff]  }
  0x84   :  { %1622 = vmatpush3.bf16.msra.mxu0 %v1714_v19  ;;  %v1766_v8 = vld [vmem:[#allocation10 + $0x108] ss:$12 sps:$4 sm:$0xff]   ;;  %v1771_v10 = vld [vmem:[#allocation10 + $0x120] ss:$12 sps:$4 sm:$0xff]   ;;  %v1776_v12 = vld [vmem:[#allocation10 + $0x138] ss:$12 sps:$4 sm:$0xff]  }
  0x85   :  { %1623 = vmatprep.subr.bf16.mxu0 %v2021_v0  ;;  %366 = vmatpush1.bf16.msra.mxu1 %v1717_v21  ;;  %v1778_v11 = vld [vmem:[#allocation10 + $0x13c] ss:$12 sps:$4 sm:$0xff]   ;;  %v1783_v13 = vld [vmem:[#allocation10 + $0x154] ss:$12 sps:$4 sm:$0xff]   ;;  %v1784_v14 = vld [vmem:[#allocation10 + $0x158] ss:$12 sps:$4 sm:$0xff]  }
  0x86   :  { %367 = vmatprep.subr.bf16.mxu1 %v1719_v22  ;;  %v1781_v15 = vld [vmem:[#allocation10 + $0x150] ss:$12 sps:$4 sm:$0xff]   ;;  %v1785_v16 = vld [vmem:[#allocation10 + $0x98] ss:$12 sps:$4 sm:$0xff]   ;;  %v1786_v19 = vld [vmem:[#allocation10 + $0x168] ss:$12 sps:$4 sm:$0xff]   ;;  %v212_v22 = vlaneseq }
  0x87   :  { %v1788_v17 = vld [vmem:[#allocation10 + $0x16c] ss:$12 sps:$4 sm:$0xff]   ;;  %v1789_v18 = vld [vmem:[#allocation10 + $0x170] ss:$12 sps:$4 sm:$0xff]   ;;  %s2025_s25 = smov [#allocation13]  }
  0x88   :  { %1624 = vmatpush3.bf16.msra.mxu0 %v1718_v23  ;;  %v1790_v20 = vld [vmem:[#allocation10 + $0xb0] ss:$12 sps:$4 sm:$0xff]   ;;  %v2182_v23 = vshrl.u32 %v212_v22, 7  ;;  %v1837_v22 = vld [vmem:[#allocation11 + $0x20] sm:$0xff]   ;;  %s1393_s26 = sshll.u32 %s2025_s25, 4  ;;  %s1394_s26 = int_to_ptr.vmem [resolvable:$true] %s1393_s26 }
  0x89   :  { %1625 = vmatprep.subr.bf16.mxu0 %v2021_v0  ;;  %368 = vmatpush1.bf16.msra.mxu1 %v1721_v24  ;;  %v1793_v21 = vld [vmem:[#allocation10 + $0x184] ss:$12 sps:$4 sm:$0xff]   ;;  %s1979_s27 = scalar_lea.vmem %s1394_s26, 128  ;;  %p1984_p7 = scmp.lt.s32.totalorder %s1394_s26, %s1394_s26 }
  0x8a   :  { %369 = vmatprep.subr.bf16.mxu1 %v1723_v25  ;;  %v214_v24 = vsub.s32 0, %v2182_v23  ;;  %v210_v25 = vld [vmem:[%s2247_s4] sm:$0x7]  ;;  %p1980_p6 = scmp.ne.s32.totalorder %s1394_s26, %s1979_s27  ;;  %p1985_p8 = scmp.lt.s32.totalorder %s1979_s27, %s1979_s27 }
  0x8c   :  { %1626 = vmatpush3.bf16.msra.mxu0 %v1722_v26  ;;  %v218_v26 = vsub.s32 1, %v2182_v23  ;;  %p1986_p9 = por %p1985_p8, %p1984_p7 }
  0x8d   :  { %1627 = vmatprep.subr.bf16.mxu0 %v2021_v0  ;;  %370 = vmatpush1.bf16.msra.mxu1 %v1725_v27  ;;  %v215_v27 = vrot.slane %v210_v25, %v214_v24 }
  0x8e   :  { %939 = vmatprep.subr.bf16.mxu1 %v1729_v30  ;;  %p1987_p10 = pnand %p1986_p9, %p1980_p6 }
  0x90   :  { %1628 = vmatpush3.bf16.msra.mxu0 %v1726_v28  ;;  %v219_v28 = vrot.slane %v210_v25, %v218_v26 }
  0x91   :  { %1545 = vmatprep.subr.bf16.mxu0 %v1754_v31 }
 0x146   :  { %v161_v33 = vpop.f32.mrb[0].mxu0 }
 0x147   :  { %vm174_vm2 = vcmp.eq.f32.partialorder %v161_v33, %v1407_v32  ;;  %v1611_v36 = vpop.f32.mrb[1].mxu0 }
 0x148   :  { %vm1433_vm3 = vmpackc.low %vm174_vm2, %vm174_vm2  ;;  %v164_v39 = vpop.f32.mrb[2].mxu0 }
 0x149   :  { %v1612_v40 = vpop.f32.mrb[3].mxu0  ;;  %1434 = vmatmul.mubr.msk.bf16.vlgmr.msra.gmra.mrb[0].mxu1 %vm1433_vm3, %v2024_v41  ;;  %1630 = vmatmul.mubr.msk.bf16.vlgmr.msra.gmra.mrb[4].mxu0 %vm1433_vm3, %v2024_v41 }
 0x14a   :  { %940 = vmatpush1.bf16.msra.mxu1 %v1727_v34  ;;  %1546 = vmatpush3.bf16.msra.mxu0 %v1755_v35 }
 0x14b   :  { %941 = vmatprep.subr.bf16.mxu1 %v1732_v37  ;;  %1547 = vmatprep.subr.bf16.mxu0 %v1759_v38 }
 0x14e   :  { %942 = vmatpush1.bf16.msra.mxu1 %v1730_v42  ;;  %1548 = vmatpush3.bf16.msra.mxu0 %v1760_v43  ;;  %v1791_v43 = vld [vmem:[#allocation10 + $0x180] ss:$12 sps:$4 sm:$0xff]  }
 0x14f   :  { %943 = vmatprep.subr.bf16.mxu1 %v1735_v44  ;;  %1549 = vmatprep.subr.bf16.mxu0 %v1764_v45  ;;  %v1794_v44 = vld [vmem:[#allocation10 + $0x188] ss:$12 sps:$4 sm:$0xff]  }
 0x152   :  { %944 = vmatpush1.bf16.msra.mxu1 %v1733_v46  ;;  %1550 = vmatpush3.bf16.msra.mxu0 %v1765_v47  ;;  %v1797_v46 = vld [vmem:[#allocation10 + $0x19c] ss:$12 sps:$4 sm:$0xff]   ;;  %v1795_v47 = vld [vmem:[#allocation10 + $0x198] ss:$12 sps:$4 sm:$0xff]  }
 0x153   :  { %945 = vmatprep.subr.bf16.mxu1 %v1738_v48  ;;  %1551 = vmatprep.subr.bf16.mxu0 %v1769_v49  ;;  %v1798_v48 = vld [vmem:[#allocation10 + $0x1a0] ss:$12 sps:$4 sm:$0xff]  }
 0x154   :  { %v1801_v49 = vld [vmem:[#allocation10 + $0x1b4] ss:$12 sps:$4 sm:$0xff]  }
 0x156   :  { %946 = vmatpush1.bf16.msra.mxu1 %v1736_v50  ;;  %1552 = vmatpush3.bf16.msra.mxu0 %v1770_v51  ;;  %v1799_v50 = vld [vmem:[#allocation10 + $0x1b0] ss:$12 sps:$4 sm:$0xff]   ;;  %v1802_v51 = vld [vmem:[#allocation10 + $0x1b8] ss:$12 sps:$4 sm:$0xff]  }
 0x157   :  { %947 = vmatprep.subr.bf16.mxu1 %v1741_v52  ;;  %1553 = vmatprep.subr.bf16.mxu0 %v1774_v53  ;;  %v1805_v52 = vld [vmem:[#allocation10 + $0x1cc] ss:$12 sps:$4 sm:$0xff]   ;;  %v1803_v53 = vld [vmem:[#allocation10 + $0x1c8] ss:$12 sps:$4 sm:$0xff]  }
 0x15a   :  { %948 = vmatpush1.bf16.msra.mxu1 %v1739_v54  ;;  %1554 = vmatpush3.bf16.msra.mxu0 %v1775_v55  ;;  %v1806_v54 = vld [vmem:[#allocation10 + $0x1d0] ss:$12 sps:$4 sm:$0xff]  }
 0x15b   :  { %949 = vmatprep.subr.bf16.mxu1 %v1744_v56  ;;  %1555 = vmatprep.subr.bf16.mxu0 %v1779_v57  ;;  %v1809_v55 = vld [vmem:[#allocation10 + $0x1e4] ss:$12 sps:$4 sm:$0xff]   ;;  %v1810_v56 = vld [vmem:[#allocation10 + $0x1e8] ss:$12 sps:$4 sm:$0xff]   ;;  %v222_v57 = vsub.s32 2, %v2182_v23 }
 0x15e   :  { %950 = vmatpush1.bf16.msra.mxu1 %v1742_v58  ;;  %1556 = vmatpush3.bf16.msra.mxu0 %v1780_v59  ;;  %v1813_v58 = vld [vmem:[#allocation10 + $0x1fc] ss:$12 sps:$4 sm:$0xff]   ;;  %v1811_v59 = vld [vmem:[#allocation10 + $0x1f8] ss:$12 sps:$4 sm:$0xff]  }
 0x15f   :  { %951 = vmatprep.subr.bf16.mxu1 %v1747_v60  ;;  %1557 = vmatprep.subr.bf16.mxu0 %v1784_v14  ;;  %v1814_v60 = vld [vmem:[#allocation10 + $0x200] ss:$12 sps:$4 sm:$0xff]   ;;  %v1830_v14 = vld [vmem:[#allocation11 + $0x50] sm:$0xff]  }
 0x162   :  { %952 = vmatpush1.bf16.msra.mxu1 %v1745_v61  ;;  %1558 = vmatpush3.bf16.msra.mxu0 %v1785_v16  ;;  %v223_v61 = vrot.slane %v210_v25, %v222_v57  ;;  %v1831_v16 = vld [vmem:[#allocation11 + $0x10] sm:$0xff]   ;;  %v1839_v25 = vld [vmem:[#allocation11 + $0x68] sm:$0xff]  }
 0x163   :  { %953 = vmatprep.subr.bf16.mxu1 %v1750_v62  ;;  %1559 = vmatprep.subr.bf16.mxu0 %v1789_v18  ;;  %v1817_v62 = vld [vmem:[#allocation10 + $0x214] ss:$12 sps:$4 sm:$0xff]   ;;  %v1832_v18 = vld [vmem:[#allocation11 + $0x98] sm:$0xff]  }
 0x166   :  { %954 = vmatpush1.bf16.msra.mxu1 %v1748_v63  ;;  %1560 = vmatpush3.bf16.msra.mxu0 %v1790_v20  ;;  %v1815_v63 = vld [vmem:[#allocation10 + $0x210] ss:$12 sps:$4 sm:$0xff]   ;;  %v1836_v20 = vld [vmem:[#allocation11 + $0x60] sm:$0xff]  }
 0x167   :  { %955 = vmatprep.subr.bf16.mxu1 %v1753_v1  ;;  %1633 = vmatprep.subr.bf16.mxu0 %v2021_v0  ;;  %v1818_v1 = vld [vmem:[#allocation10 + $0x218] ss:$12 sps:$4 sm:$0xff]  }
 0x16a   :  { %956 = vmatpush1.bf16.msra.mxu1 %v1751_v2 }
 0x16b   :  { %957 = vmatprep.subr.bf16.mxu1 %v1758_v3  ;;  %v1821_v3 = vld [vmem:[#allocation10 + $0x22c] ss:$12 sps:$4 sm:$0xff]  }
 0x16e   :  { %958 = vmatpush1.bf16.msra.mxu1 %v1756_v4  ;;  %v1819_v4 = vld [vmem:[#allocation10 + $0x228] ss:$12 sps:$4 sm:$0xff]  }
 0x16f   :  { %959 = vmatprep.subr.bf16.mxu1 %v1763_v5  ;;  %v1822_v5 = vld [vmem:[#allocation10 + $0x230] ss:$12 sps:$4 sm:$0xff]  }
 0x172   :  { %960 = vmatpush1.bf16.msra.mxu1 %v1761_v6 }
 0x173   :  { %961 = vmatprep.subr.bf16.mxu1 %v1768_v7 }
 0x176   :  { %962 = vmatpush1.bf16.msra.mxu1 %v1766_v8  ;;  %v1823_v8 = vld [vmem:[#allocation11 + $0x80] sm:$0xff]  }
 0x177   :  { %963 = vmatprep.subr.bf16.mxu1 %v1773_v9  ;;  %v1824_v9 = vld [vmem:[#allocation11 + $0x40] sm:$0xff]  }
 0x17a   :  { %964 = vmatpush1.bf16.msra.mxu1 %v1771_v10  ;;  %v1825_v10 = vld [vmem:[#allocation11] sm:$0xff]  }
 0x17b   :  { %965 = vmatprep.subr.bf16.mxu1 %v1778_v11  ;;  %v1827_v11 = vld [vmem:[#allocation11 + $0x48] sm:$0xff]  }
 0x17e   :  { %966 = vmatpush1.bf16.msra.mxu1 %v1776_v12  ;;  %v1826_v12 = vld [vmem:[#allocation11 + $0x88] sm:$0xff]  }
 0x17f   :  { %967 = vmatprep.subr.bf16.mxu1 %v1783_v13  ;;  %v1828_v13 = vld [vmem:[#allocation11 + $0x8] sm:$0xff]  }
 0x182   :  { %968 = vmatpush1.bf16.msra.mxu1 %v1781_v15  ;;  %v1829_v15 = vld [vmem:[#allocation11 + $0x90] sm:$0xff]  }
 0x183   :  { %969 = vmatprep.subr.bf16.mxu1 %v1788_v17  ;;  %v1833_v17 = vld [vmem:[#allocation11 + $0x58] sm:$0xff]  }
 0x186   :  { %970 = vmatpush1.bf16.msra.mxu1 %v1786_v19  ;;  %v1834_v19 = vld [vmem:[#allocation11 + $0x18] sm:$0xff]  }
 0x187   :  { %980 = vmatprep.subr.bf16.mxu1 %v1793_v21  ;;  %v1835_v21 = vld [vmem:[#allocation11 + $0xa0] sm:$0xff]  }
 0x21c   :  { %v389_v30 = vpop.f32.mrb[0].mxu1  ;;  %v2193_v31 = vpop.f32.mrb[4].mxu0 }
 0x21d   :  { %v390_v32 = vadd.f32 %v389_v30, %v215_v27  ;;  %v391_v33 = vpop.f32.mrb[1].mxu1  ;;  %v1631_v34 = vpop.f32.mrb[5].mxu0  ;;  %v431_v2 = vadd.f32 %v2193_v31, %v223_v61  ;;  %v1838_v27 = vld [vmem:[#allocation11 + $0xa8] sm:$0xff]   ;;  %v1841_v30 = vld [vmem:[#allocation11 + $0xb0] sm:$0xff]  }
 0x21e   :  { %v392_v35 = vadd.f32 %v391_v33, %v219_v28  ;;  %v393_v36 = vpop.f32.mrb[2].mxu1  ;;  %v433_v37 = vpop.f32.mrb[6].mxu0  ;;  %v1840_v28 = vld [vmem:[#allocation11 + $0x28] sm:$0xff]   ;;  %v1842_v31 = vld [vmem:[#allocation11 + $0x70] sm:$0xff]   ;;  %v1844_v33 = vld [vmem:[#allocation11 + $0xb8] sm:$0xff]  }
 0x21f   :  { %v436_v38 = vmax.f32 %v390_v32, 0.0  ;;  %v394_v39 = vpop.f32.mrb[3].mxu1  ;;  %v1632_v40 = vpop.f32.mrb[7].mxu0  ;;  %v438_v6 = vmax.f32 %v431_v2, 0.0  ;;  %v1843_v32 = vld [vmem:[#allocation11 + $0x30] sm:$0xff]   ;;  %v1845_v34 = vld [vmem:[#allocation11 + $0x78] sm:$0xff]  }
 0x220   :  { %v437_v41 = vmax.f32 %v392_v35, 0.0  ;;  %v1846_v35 = vld [vmem:[#allocation11 + $0x38] sm:$0xff]  }
 0x221   :  { %v439_v45 = vpack.c.bf16 %v436_v38, %v436_v38  ;;  %v441_v7 = vpack.c.bf16 %v438_v6, %v438_v6 }
 0x222   :  { %v440_v42 = vpack.c.bf16 %v437_v41, %v437_v41  ;;  %v538_v41 = vld [vmem:[%s2249_s6] sm:$0x7] }
 0x224   :  { %971 = vmatprep.mubr.bf16.mxu1 %v440_v42  ;;  %1053 = vmatprep.mubr.bf16.mxu0 %v440_v42  ;;  %v551_v42 = vrot.slane %v538_v41, %v222_v57 }
 0x225   :  { %972 = vmatmul.mubr.bf16.vlgmr.msra.gmra.mrb[4].mxu1 %v439_v45  ;;  %1054 = vmatmul.mubr.bf16.vlgmr.msra.gmra.mrb[8].mxu0 %v439_v45 }
 0x226   :  { %981 = vmatpush1.bf16.msra.mxu1 %v1791_v43  ;;  %1634 = vmatpush3.bf16.msra.mxu0 %v1794_v44  ;;  %v547_v43 = vrot.slane %v538_v41, %v218_v26 }
 0x227   :  { %982 = vmatprep.subr.bf16.mxu1 %v1797_v46  ;;  %1635 = vmatprep.subr.bf16.mxu0 %v2021_v0 }
 0x228   :  { %1012 = vmatprep.mubr.bf16.mxu1 %v2023_v29  ;;  %1649 = vmatprep.mubr.msk.bf16.mxu0 %vm2022_vm0, %v2021_v0  ;;  %v1807_v29 = vld [vmem:[#allocation10 + $0x1e0] ss:$12 sps:$4 sm:$0xff]  }
 0x22a   :  { %983 = vmatpush1.bf16.msra.mxu1 %v1795_v47  ;;  %1636 = vmatpush3.bf16.msra.mxu0 %v1798_v48 }
 0x22b   :  { %984 = vmatprep.subr.bf16.mxu1 %v1801_v49  ;;  %1637 = vmatprep.subr.bf16.mxu0 %v2021_v0 }
 0x22e   :  { %985 = vmatpush1.bf16.msra.mxu1 %v1799_v50  ;;  %1638 = vmatpush3.bf16.msra.mxu0 %v1802_v51 }
 0x22f   :  { %986 = vmatprep.subr.bf16.mxu1 %v1805_v52  ;;  %1639 = vmatprep.subr.bf16.mxu0 %v2021_v0 }
 0x232   :  { %987 = vmatpush1.bf16.msra.mxu1 %v1803_v53  ;;  %1640 = vmatpush3.bf16.msra.mxu0 %v1806_v54 }
 0x233   :  { %988 = vmatprep.subr.bf16.mxu1 %v1809_v55  ;;  %1641 = vmatprep.subr.bf16.mxu0 %v2021_v0 }
 0x236   :  { %989 = vmatpush1.bf16.msra.mxu1 %v1807_v29  ;;  %1642 = vmatpush3.bf16.msra.mxu0 %v1810_v56 }
 0x237   :  { %990 = vmatprep.subr.bf16.mxu1 %v1813_v58  ;;  %1643 = vmatprep.subr.bf16.mxu0 %v2021_v0 }
 0x23a   :  { %991 = vmatpush1.bf16.msra.mxu1 %v1811_v59  ;;  %1644 = vmatpush3.bf16.msra.mxu0 %v1814_v60 }
 0x23b   :  { %992 = vmatprep.subr.bf16.mxu1 %v1817_v62  ;;  %1645 = vmatprep.subr.bf16.mxu0 %v2021_v0  ;;  %v1509_v62 = vld [vmem:[%s2251_s8] ss:$0 sm:$0xff] }
 0x23e   :  { %993 = vmatpush1.bf16.msra.mxu1 %v1815_v63  ;;  %1646 = vmatpush3.bf16.msra.mxu0 %v1818_v1 }
 0x23f   :  { %994 = vmatprep.subr.bf16.mxu1 %v1821_v3  ;;  %1647 = vmatprep.subr.bf16.mxu0 %v2021_v0 }
 0x242   :  { %995 = vmatpush1.bf16.msra.mxu1 %v1819_v4  ;;  %1648 = vmatpush3.bf16.msra.mxu0 %v1822_v5 }
 0x243   :  { %1653 = vmatprep.subr.bf16.mxu1 %v2021_v0  ;;  %1576 = vmatprep.subr.bf16.mxu0 %v1824_v9 }
 0x245   :  { %1013 = vmatmul.mubr.bf16.vlgmr.msra.gmra.mrb[4].mxu1 %v441_v7  ;;  %1650 = vmatmul.mubr.bf16.vlgmr.msra.gmra.mrb[12].mxu0 %v441_v7 }
 0x246   :  { %1669 = vmatprep.mubr.msk.bf16.mxu1 %vm2022_vm0, %v2021_v0  ;;  %1654 = vmatpush3.bf16.msra.mxu1 %v1823_v8 }
 0x247   :  { %1577 = vmatpush3.bf16.msra.mxu0 %v1825_v10  ;;  %1655 = vmatprep.subr.bf16.mxu1 %v2021_v0 }
 0x248   :  { %1578 = vmatprep.subr.bf16.mxu0 %v1827_v11 }
 0x24a   :  { %1656 = vmatpush3.bf16.msra.mxu1 %v1826_v12 }
 0x24b   :  { %1579 = vmatpush3.bf16.msra.mxu0 %v1828_v13  ;;  %1657 = vmatprep.subr.bf16.mxu1 %v2021_v0 }
 0x24c   :  { %1580 = vmatprep.subr.bf16.mxu0 %v1830_v14 }
 0x24e   :  { %1658 = vmatpush3.bf16.msra.mxu1 %v1829_v15 }
 0x24f   :  { %1581 = vmatpush3.bf16.msra.mxu0 %v1831_v16  ;;  %1659 = vmatprep.subr.bf16.mxu1 %v2021_v0 }
 0x250   :  { %1582 = vmatprep.subr.bf16.mxu0 %v1833_v17 }
 0x252   :  { %1660 = vmatpush3.bf16.msra.mxu1 %v1832_v18 }
 0x253   :  { %1583 = vmatpush3.bf16.msra.mxu0 %v1834_v19  ;;  %1661 = vmatprep.subr.bf16.mxu1 %v2021_v0 }
 0x254   :  { %1584 = vmatprep.subr.bf16.mxu0 %v1836_v20 }
 0x256   :  { %1662 = vmatpush3.bf16.msra.mxu1 %v1835_v21 }
 0x257   :  { %1585 = vmatpush3.bf16.msra.mxu0 %v1837_v22  ;;  %1663 = vmatprep.subr.bf16.mxu1 %v2021_v0 }
 0x258   :  { %1586 = vmatprep.subr.bf16.mxu0 %v1839_v25 }
 0x25a   :  { %1664 = vmatpush3.bf16.msra.mxu1 %v1838_v27 }
 0x25b   :  { %1587 = vmatpush3.bf16.msra.mxu0 %v1840_v28  ;;  %1665 = vmatprep.subr.bf16.mxu1 %v2021_v0 }
 0x25c   :  { %1588 = vmatprep.subr.bf16.mxu0 %v1842_v31 }
 0x25e   :  { %1666 = vmatpush3.bf16.msra.mxu1 %v1841_v30 }
 0x25f   :  { %1667 = vmatprep.subr.bf16.mxu1 %v2021_v0  ;;  %1589 = vmatpush3.bf16.msra.mxu0 %v1843_v32  ;;  %v543_v0 = vrot.slane %v538_v41, %v214_v24 }
 0x260   :  { %1590 = vmatprep.subr.bf16.mxu0 %v1845_v34 }
 0x262   :  { %1668 = vmatpush3.bf16.msra.mxu1 %v1844_v33 }
 0x263   :  { %1591 = vmatpush3.bf16.msra.mxu0 %v1846_v35 }
 0x2f8   :  { %v1561_v36 = vpop.f32.mrb[8].mxu0 }
 0x2f9   :  { %v1562_v37 = vpop.f32.mrb[9].mxu0 }
 0x2fa   :  { %v1563_v38 = vadd.f32 %v1562_v37, %v1561_v36  ;;  %v1564_v39 = vpop.f32.mrb[10].mxu0 }
 0x2fb   :  { %v1565_v40 = vpop.f32.mrb[11].mxu0 }
 0x2fc   :  { %v1056_v44 = vadd.f32 %v1563_v38, %v551_v42 }
 0x318   :  { %v1014_v45 = vpop.f32.mrb[4].mxu1  ;;  %v1095_v46 = vpop.f32.mrb[12].mxu0 }
 0x319   :  { %v1673_v47 = vadd.f32 %v1014_v45, %v543_v0  ;;  %v1096_v48 = vadd.f32 %v1095_v46, %v1056_v44  ;;  %v1016_v49 = vpop.f32.mrb[5].mxu1  ;;  %v1651_v50 = vpop.f32.mrb[13].mxu0 }
 0x31a   :  { %v1674_v51 = vadd.f32 %v1016_v49, %v547_v43  ;;  %v1018_v52 = vpop.f32.mrb[6].mxu1  ;;  %v1098_v53 = vpop.f32.mrb[14].mxu0 }
 0x31b   :  { %v1101_v54 = vmax.f32 %v1673_v47, 0.0  ;;  %v1103_v55 = vmax.f32 %v1096_v48, 0.0  ;;  %v1019_v29 = vpop.f32.mrb[7].mxu1  ;;  %v1652_v56 = vpop.f32.mrb[15].mxu0 }
 0x31c   :  { %v1102_v57 = vmax.f32 %v1674_v51, 0.0 }
 0x31d   :  { %v1106_v58 = vpack.c.bf16 %v1103_v55, %v1103_v55  ;;  %v1104_v59 = vpack.c.bf16 %v1101_v54, %v1101_v54 }
 0x31e   :  { %v1105_v24 = vpack.c.bf16 %v1102_v57, %v1102_v57 }
 0x31f   :  { %1670 = vmatmul.mubr.bf16.vlgmr.msra.gmra.mrb[8].mxu1 %v1106_v58 }
 0x320   :  { %1338 = vmatprep.mubr.bf16.mxu0 %v1105_v24 }
 0x321   :  { %1339 = vmatmul.mubr.bf16.vlgmr.msra.gmra.mrb[16].mxu0 %v1104_v59 }
 0x3f2   :  { %v1380_v23 = vpop.f32.mrb[8].mxu1 }
 0x3f3   :  { %v1671_v26 = vpop.f32.mrb[9].mxu1 }
 0x3f4   :  { %v1592_v60 = vpop.f32.mrb[16].mxu0  ;;  %v1383_v61 = vpop.f32.mrb[10].mxu1 }
 0x3f5   :  { %v1593_v63 = vpop.f32.mrb[17].mxu0  ;;  %v1672_v1 = vpop.f32.mrb[11].mxu1 }
 0x3f6   :  { %v1594_v2 = vadd.f32 %v1593_v63, %v1592_v60  ;;  %v1595_v3 = vpop.f32.mrb[18].mxu0 }
 0x3f7   :  { %v1596_v4 = vpop.f32.mrb[19].mxu0 }
 0x3f8   :  { %v1341_v5 = vadd.f32 %v1594_v2, %v1509_v62 }
 0x3fa   :  { %v1381_v6 = vadd.f32 %v1380_v23, %v1341_v5 }
 0x3fc   :  { %1386 = vst [vmem:[#allocation13] sm:$0xff] %v1381_v6 }
 0x3fd   :  { %1990 = shalt.err (!%p1987_p10)
}
 0x3fe   :  { %s1991_s3 = scalar_lea.hbm %s2252_s9, 128 }
 0x3ff   :  { %p1992_p11 = scmp.ne.s32.totalorder %s2252_s9, %s1991_s3  ;;  %p1995_p12 = scmp.lt.u32.totalorder %s1991_s3, %s2252_s9 }
 0x401   :  { %p1997_p13 = pnand %p1995_p12, %p1992_p11 }
 0x403   :  { %2000 = shalt.err (!%p1997_p13)
}
 0x404   :  { %1396 = dma.vmem_to_hbm [thread:$0]  %s1394_s26, 128, %s2252_s9, [#allocation4]  }
 0x405   :  { %2009 = dma.done.wait [#allocation4], 128  }
 0x406   :  { %2010 = vsyncadd [#allocation4], 4294967168 }
 0x407   :  { %1400 = vsyncpa [#allocation3], 1 }
 0x408   :  { %1401 = vsyncpa [#allocation6], 1 }
 0x409   :  { %1402 = vsyncpa [#allocation9], 1 }
 0x40a   :  { %1403 = vsyncpa [#allocation12], 1 }
 0x40b   :  { %1404 = vsyncpa [#allocation4], 1 }

</bundles_post_ra>
